<compile_context>
chip_gen: v7x
topology: tpu7x:2x2x1
jax: 0.10.0
libtpu: 0.0.40
codegen_flags: <defaults>
</compile_context>

<pallas_src>
import functools

import jax
import jax.numpy as jnp
from jax import lax
from jax.experimental import pallas as pl
from jax.experimental.pallas import tpu as pltpu


# --------------------------------- kernel ---------------------------------------
def _basic_block_kernel(x_ref, w1_ref, w2_ref, s1_ref, b1_ref, s2_ref, b2_ref,
                        out_ref, *, H):
    # x_ref   : (M, WC)        M = batch_block * H rows, WC = W * C lanes (lane-dense)
    # w*_ref  : (3, WC, WC)    banded conv weights, one (W*Cin, W*Cout) matrix per dy
    # s*/b*   : (1, WC)        folded BatchNorm scale / bias, pre-tiled to lane width
    # out_ref : (M, WC)
    M, WC = out_ref.shape

    # Row index inside each image (batch elements are stacked contiguously along rows).
    row_in_img = lax.broadcasted_iota(jnp.int32, (M, WC), 0) % H
    not_top = row_in_img != 0          # row h-1 exists
    not_bot = row_in_img != (H - 1)    # row h+1 exists

    s1 = s1_ref[...]
    b1 = b1_ref[...]
    s2 = s2_ref[...]
    b2 = b2_ref[...]

    def conv3x3(v, wm_ref):
        # out[h] = v[h-1] @ Wm[0] + v[h] @ Wm[1] + v[h+1] @ Wm[2]   (zero rows outside)
        # Row shifts via XLU roll; border rows (and any cross-image wraparound when
        # several batch elements share a block) are zeroed by the masks.
        v_dn = jnp.where(not_top, pltpu.roll(v, shift=1, axis=0), 0.0)      # v[h-1]
        v_up = jnp.where(not_bot, pltpu.roll(v, shift=M - 1, axis=0), 0.0)  # v[h+1]
        acc = jnp.dot(v_dn, wm_ref[0], preferred_element_type=jnp.float32)
        acc = acc + jnp.dot(v, wm_ref[1], preferred_element_type=jnp.float32)
        acc = acc + jnp.dot(v_up, wm_ref[2], preferred_element_type=jnp.float32)
        return acc

    x = x_ref[...]                                                   # (M, WC)

    # conv1 + BN1 (folded) + ReLU
    h1 = jnp.maximum(conv3x3(x, w1_ref) * s1 + b1, 0.0)

    # conv2 + BN2 (folded)
    out2 = conv3x3(h1, w2_ref) * s2 + b2

    # residual add (identity shortcut read straight from the input slab) + ReLU
    out_ref[...] = jnp.maximum(out2 + x, 0.0)


# ------------------------------ wrapper helpers ----------------------------------
def _fold_bn(bn_params, eps=1e-5):
    """Fold eval-mode BatchNorm into per-channel scale/bias (shape (C,))."""
    gamma, beta, mean, var = bn_params
    scale = gamma / jnp.sqrt(var + eps)
    bias = beta - mean * scale
    return scale, bias


def _band_weights(w_hwio, W):
    """Turn (3, 3, Cin, Cout) conv weights into 3 banded (W*Cin, W*Cout) matrices.

    Wm[dy][wi*Cin + ci, wo*Cout + co] = w[dy, wi - wo + 1, ci, co] if |wi - wo| <= 1 else 0
    so a whole image row of the 3x3 conv becomes one (W*Cin)->(W*Cout) matmul.
    """
    _, _, Cin, Cout = w_hwio.shape
    wi = jnp.arange(W)[:, None]
    wo = jnp.arange(W)[None, :]
    dx = wi - wo + 1
    valid = (dx >= 0) & (dx <= 2)
    dx_c = jnp.clip(dx, 0, 2)
    mats = []
    for dy in range(3):
        blk = w_hwio[dy][dx_c]                                   # (W, W, Cin, Cout)
        blk = jnp.where(valid[:, :, None, None], blk, 0.0)
        mats.append(jnp.transpose(blk, (0, 2, 1, 3)).reshape(W * Cin, W * Cout))
    return jnp.stack(mats, axis=0)                               # (3, W*Cin, W*Cout)


def basic_block_forward(x_nchw, w1_hwio, w2_hwio, bn1, bn2, *, batch_block=1):
    """BasicBlock forward. Takes/returns NCHW to match the PyTorch module."""
    N, Cin, H, W = x_nchw.shape
    Cout = w1_hwio.shape[-1]
    # TODO(synk): Cin != Cout / strided shortcut not handled in-kernel (identity only).
    assert Cin == Cout, "identity-shortcut configuration only (in_planes == planes)"
    assert N % batch_block == 0
    WC = W * Cout

    # NCHW -> NHWC -> lane-dense (N*H, W*C) slab. No padding, no duplicate shortcut.
    x2d = jnp.transpose(x_nchw, (0, 2, 3, 1)).astype(jnp.float32).reshape(N * H, WC)

    w1m = _band_weights(w1_hwio.astype(jnp.float32), W)          # (3, WC, WC)
    w2m = _band_weights(w2_hwio.astype(jnp.float32), W)

    s1, b1 = _fold_bn(bn1)
    s2, b2 = _fold_bn(bn2)
    # Pre-tile per-channel scale/bias to lane width (index w*Cout + co -> value[co]).
    s1t = jnp.tile(s1, W).reshape(1, WC)
    b1t = jnp.tile(b1, W).reshape(1, WC)
    s2t = jnp.tile(s2, W).reshape(1, WC)
    b2t = jnp.tile(b2, W).reshape(1, WC)

    rows_per_block = batch_block * H
    grid = (N // batch_block,)

    kernel = functools.partial(_basic_block_kernel, H=H)

    out2d = pl.pallas_call(
        kernel,
        out_shape=jax.ShapeDtypeStruct((N * H, WC), jnp.float32),
        grid_spec=pltpu.PrefetchScalarGridSpec(
            num_scalar_prefetch=0,
            grid=grid,
            in_specs=[
                pl.BlockSpec((rows_per_block, WC), lambda i: (i, 0)),
                pl.BlockSpec((3, WC, WC), lambda i: (0, 0, 0)),
                pl.BlockSpec((3, WC, WC), lambda i: (0, 0, 0)),
                pl.BlockSpec((1, WC), lambda i: (0, 0)),
                pl.BlockSpec((1, WC), lambda i: (0, 0)),
                pl.BlockSpec((1, WC), lambda i: (0, 0)),
                pl.BlockSpec((1, WC), lambda i: (0, 0)),
            ],
            out_specs=pl.BlockSpec((rows_per_block, WC), lambda i: (i, 0)),
        ),
        compiler_params=pltpu.CompilerParams(
            dimension_semantics=("parallel",)),
    )(x2d, w1m, w2m, s1t, b1t, s2t, b2t)

    return jnp.transpose(out2d.reshape(N, H, W, Cout), (0, 3, 1, 2))   # back to NCHW


# ----------------------------- pure-JAX reference -------------------------------
def _reference_forward(x_nchw, w1_hwio, w2_hwio, bn1, bn2, eps=1e-5):
    def conv(x, w_hwio):
        w_oihw = jnp.transpose(w_hwio, (3, 2, 0, 1))
        return lax.conv_general_dilated(
            x, w_oihw, window_strides=(1, 1), padding=((1, 1), (1, 1)),
            dimension_numbers=('NCHW', 'OIHW', 'NCHW'))

    def bn(x, p):
        gamma, beta, mean, var = (t.reshape(1, -1, 1, 1) for t in p)
        return (x - mean) / jnp.sqrt(var + eps) * gamma + beta

    out = jax.nn.relu(bn(conv(x_nchw, w1_hwio), bn1))
    out = bn(conv(out, w2_hwio), bn2)
    out = out + x_nchw        # identity shortcut (stride=1, in_planes == planes)
    return jax.nn.relu(out)


if __name__ == "__main__":
    key = jax.random.PRNGKey(0)
    ks = jax.random.split(key, 6)

    # C * W = 128 -> exactly one lane-dense vreg row per image row.
    N, C, H, W = 2, 8, 16, 16
    x = jax.random.normal(ks[0], (N, C, H, W), jnp.float32)

    # conv weights (no bias, per nn.Conv2d(..., bias=False)), stored HWIO.
    w1 = 0.1 * jax.random.normal(ks[1], (3, 3, C, C), jnp.float32)
    w2 = 0.1 * jax.random.normal(ks[2], (3, 3, C, C), jnp.float32)

    def bn_params(k):
        k1, k2, k3, k4 = jax.random.split(k, 4)
        gamma = 1.0 + 0.1 * jax.random.normal(k1, (C,), jnp.float32)
        beta = 0.1 * jax.random.normal(k2, (C,), jnp.float32)
        mean = 0.1 * jax.random.normal(k3, (C,), jnp.float32)
        var = 0.5 + 0.1 * jnp.abs(jax.random.normal(k4, (C,), jnp.float32))
        return (gamma, beta, mean, var)

    bn1 = bn_params(ks[3])
    bn2 = bn_params(ks[4])

    out = basic_block_forward(x, w1, w2, bn1, bn2, batch_block=1)
    out = jax.block_until_ready(out)

    ref = _reference_forward(x, w1, w2, bn1, bn2)
    err = float(jnp.max(jnp.abs(out - ref)))
    assert out.shape == (N, C, H, W)
    assert jnp.allclose(out, ref, atol=1e-4, rtol=1e-4), f"max abs err = {err}"

    print("KERNEL_OK")
</pallas_src>

<mosaic_0001>
module attributes {stable_mosaic.version = 11 : i64} {
  func.func @_basic_block_kernel(%arg0: i32, %arg1: memref<16x128xf32, #tpu.memory_space<vmem>>, %arg2: memref<3x128x128xf32, #tpu.memory_space<vmem>>, %arg3: memref<3x128x128xf32, #tpu.memory_space<vmem>>, %arg4: memref<1x128xf32, #tpu.memory_space<vmem>>, %arg5: memref<1x128xf32, #tpu.memory_space<vmem>>, %arg6: memref<1x128xf32, #tpu.memory_space<vmem>>, %arg7: memref<1x128xf32, #tpu.memory_space<vmem>>, %arg8: memref<16x128xf32, #tpu.memory_space<vmem>>) attributes {dimension_semantics = [#tpu.dimension_semantics<parallel>], iteration_bounds = array<i64: 2>, scalar_prefetch = 0 : i64, scratch_operands = 0 : i64, tpu.core_type = #tpu.core_type<tc>, window_params = [{transform_indices = @transform_0, window_bounds = array<i64: 16, 128>}, {pipeline_mode = #tpu.pipeline_mode<synchronous>, transform_indices = @transform_1, window_bounds = array<i64: 3, 128, 128>}, {pipeline_mode = #tpu.pipeline_mode<synchronous>, transform_indices = @transform_2, window_bounds = array<i64: 3, 128, 128>}, {pipeline_mode = #tpu.pipeline_mode<synchronous>, transform_indices = @transform_3, window_bounds = array<i64: 1, 128>}, {pipeline_mode = #tpu.pipeline_mode<synchronous>, transform_indices = @transform_4, window_bounds = array<i64: 1, 128>}, {pipeline_mode = #tpu.pipeline_mode<synchronous>, transform_indices = @transform_5, window_bounds = array<i64: 1, 128>}, {pipeline_mode = #tpu.pipeline_mode<synchronous>, transform_indices = @transform_6, window_bounds = array<i64: 1, 128>}, {transform_indices = @transform_7, window_bounds = array<i64: 16, 128>}]} {
    %0 = tpu.iota {dimensions = array<i32: 0>} : vector<16x128xi32>
    %c16_i32 = arith.constant 16 : i32
    %c0_i32 = arith.constant 0 : i32
    %1 = arith.cmpi eq, %c16_i32, %c0_i32 : i32
    %c1_i32 = arith.constant 1 : i32
    %2 = arith.select %1, %c1_i32, %c16_i32 : i32
    %3 = vector.broadcast %2 : i32 to vector<16x128xi32>
    %4 = arith.remsi %0, %3 : vector<16x128xi32>
    %c0_i32_0 = arith.constant 0 : i32
    %5 = vector.broadcast %c0_i32_0 : i32 to vector<16x128xi32>
    %6 = arith.cmpi ne, %4, %5 : vector<16x128xi32>
    %c0_i32_1 = arith.constant 0 : i32
    %7 = vector.broadcast %c0_i32_1 : i32 to vector<16x128xi32>
    %8 = arith.cmpi slt, %4, %7 : vector<16x128xi32>
    %c0_i32_2 = arith.constant 0 : i32
    %9 = arith.cmpi slt, %2, %c0_i32_2 : i32
    %10 = vector.broadcast %9 : i1 to vector<16x128xi1>
    %11 = vector.broadcast %10 : vector<16x128xi1> to vector<16x128xi1>
    %12 = arith.xori %8, %11 : vector<16x128xi1>
    %13 = arith.andi %12, %6 : vector<16x128xi1>
    %14 = vector.broadcast %2 : i32 to vector<16x128xi32>
    %15 = arith.addi %4, %14 : vector<16x128xi32>
    %16 = arith.select %13, %15, %4 : vector<16x128xi1>, vector<16x128xi32>
    %c0_i32_3 = arith.constant 0 : i32
    %17 = vector.broadcast %c0_i32_3 : i32 to vector<16x128xi32>
    %18 = arith.cmpi ne, %16, %17 : vector<16x128xi32>
    %c15_i32 = arith.constant 15 : i32
    %19 = vector.broadcast %c15_i32 : i32 to vector<16x128xi32>
    %20 = arith.cmpi ne, %16, %19 : vector<16x128xi32>
    %c0 = arith.constant 0 : index
    %c0_4 = arith.constant 0 : index
    %21 = vector.load %arg4[%c0, %c0_4] : memref<1x128xf32, #tpu.memory_space<vmem>>, vector<1x128xf32>
    %c0_5 = arith.constant 0 : index
    %c0_6 = arith.constant 0 : index
    %22 = vector.load %arg5[%c0_5, %c0_6] : memref<1x128xf32, #tpu.memory_space<vmem>>, vector<1x128xf32>
    %c0_7 = arith.constant 0 : index
    %c0_8 = arith.constant 0 : index
    %23 = vector.load %arg6[%c0_7, %c0_8] : memref<1x128xf32, #tpu.memory_space<vmem>>, vector<1x128xf32>
    %c0_9 = arith.constant 0 : index
    %c0_10 = arith.constant 0 : index
    %24 = vector.load %arg7[%c0_9, %c0_10] : memref<1x128xf32, #tpu.memory_space<vmem>>, vector<1x128xf32>
    %c0_11 = arith.constant 0 : index
    %c0_12 = arith.constant 0 : index
    %25 = vector.load %arg1[%c0_11, %c0_12] : memref<16x128xf32, #tpu.memory_space<vmem>>, vector<16x128xf32>
    %c1_i32_13 = arith.constant 1 : i32
    %26 = tpu.dynamic_rotate %25 by %c1_i32_13 dim 0 : vector<16x128xf32>, i32 -> vector<16x128xf32>
    %cst = arith.constant 0.000000e+00 : f32
    %27 = vector.broadcast %cst : f32 to vector<16x128xf32>
    %28 = arith.select %18, %26, %27 : vector<16x128xi1>, vector<16x128xf32>
    %c15_i32_14 = arith.constant 15 : i32
    %29 = tpu.dynamic_rotate %25 by %c15_i32_14 dim 0 : vector<16x128xf32>, i32 -> vector<16x128xf32>
    %cst_15 = arith.constant 0.000000e+00 : f32
    %30 = vector.broadcast %cst_15 : f32 to vector<16x128xf32>
    %31 = arith.select %20, %29, %30 : vector<16x128xi1>, vector<16x128xf32>
    %c0_16 = arith.constant 0 : index
    %c0_17 = arith.constant 0 : index
    %c0_18 = arith.constant 0 : index
    %32 = vector.load %arg2[%c0_16, %c0_17, %c0_18] : memref<3x128x128xf32, #tpu.memory_space<vmem>>, vector<1x128x128xf32>
    %33 = vector.shape_cast %32 : vector<1x128x128xf32> to vector<128x128xf32>
    %cst_19 = arith.constant dense<0.000000e+00> : vector<16x128xf32>
    %34 = tpu.matmul %28, %33, %cst_19 {dimension_numbers = #tpu.dot_dimension_numbers<[1], [0], [0], [1], [0, 0, 1, 1], [], []>} : vector<16x128xf32>, vector<128x128xf32>, vector<16x128xf32> -> vector<16x128xf32>
    %c1 = arith.constant 1 : index
    %c0_20 = arith.constant 0 : index
    %c0_21 = arith.constant 0 : index
    %35 = vector.load %arg2[%c1, %c0_20, %c0_21] : memref<3x128x128xf32, #tpu.memory_space<vmem>>, vector<1x128x128xf32>
    %36 = vector.shape_cast %35 : vector<1x128x128xf32> to vector<128x128xf32>
    %cst_22 = arith.constant dense<0.000000e+00> : vector<16x128xf32>
    %37 = tpu.matmul %25, %36, %cst_22 {dimension_numbers = #tpu.dot_dimension_numbers<[1], [0], [0], [1], [0, 0, 1, 1], [], []>} : vector<16x128xf32>, vector<128x128xf32>, vector<16x128xf32> -> vector<16x128xf32>
    %38 = arith.addf %34, %37 : vector<16x128xf32>
    %c2 = arith.constant 2 : index
    %c0_23 = arith.constant 0 : index
    %c0_24 = arith.constant 0 : index
    %39 = vector.load %arg2[%c2, %c0_23, %c0_24] : memref<3x128x128xf32, #tpu.memory_space<vmem>>, vector<1x128x128xf32>
    %40 = vector.shape_cast %39 : vector<1x128x128xf32> to vector<128x128xf32>
    %cst_25 = arith.constant dense<0.000000e+00> : vector<16x128xf32>
    %41 = tpu.matmul %31, %40, %cst_25 {dimension_numbers = #tpu.dot_dimension_numbers<[1], [0], [0], [1], [0, 0, 1, 1], [], []>} : vector<16x128xf32>, vector<128x128xf32>, vector<16x128xf32> -> vector<16x128xf32>
    %42 = arith.addf %38, %41 : vector<16x128xf32>
    %43 = vector.broadcast %21 : vector<1x128xf32> to vector<16x128xf32>
    %44 = arith.mulf %42, %43 : vector<16x128xf32>
    %45 = vector.broadcast %22 : vector<1x128xf32> to vector<16x128xf32>
    %46 = arith.addf %44, %45 : vector<16x128xf32>
    %cst_26 = arith.constant 0.000000e+00 : f32
    %47 = vector.broadcast %cst_26 : f32 to vector<16x128xf32>
    %48 = arith.maximumf %46, %47 : vector<16x128xf32>
    %c1_i32_27 = arith.constant 1 : i32
    %49 = tpu.dynamic_rotate %48 by %c1_i32_27 dim 0 : vector<16x128xf32>, i32 -> vector<16x128xf32>
    %cst_28 = arith.constant 0.000000e+00 : f32
    %50 = vector.broadcast %cst_28 : f32 to vector<16x128xf32>
    %51 = arith.select %18, %49, %50 : vector<16x128xi1>, vector<16x128xf32>
    %c15_i32_29 = arith.constant 15 : i32
    %52 = tpu.dynamic_rotate %48 by %c15_i32_29 dim 0 : vector<16x128xf32>, i32 -> vector<16x128xf32>
    %cst_30 = arith.constant 0.000000e+00 : f32
    %53 = vector.broadcast %cst_30 : f32 to vector<16x128xf32>
    %54 = arith.select %20, %52, %53 : vector<16x128xi1>, vector<16x128xf32>
    %c0_31 = arith.constant 0 : index
    %c0_32 = arith.constant 0 : index
    %c0_33 = arith.constant 0 : index
    %55 = vector.load %arg3[%c0_31, %c0_32, %c0_33] : memref<3x128x128xf32, #tpu.memory_space<vmem>>, vector<1x128x128xf32>
    %56 = vector.shape_cast %55 : vector<1x128x128xf32> to vector<128x128xf32>
    %cst_34 = arith.constant dense<0.000000e+00> : vector<16x128xf32>
    %57 = tpu.matmul %51, %56, %cst_34 {dimension_numbers = #tpu.dot_dimension_numbers<[1], [0], [0], [1], [0, 0, 1, 1], [], []>} : vector<16x128xf32>, vector<128x128xf32>, vector<16x128xf32> -> vector<16x128xf32>
    %c1_35 = arith.constant 1 : index
    %c0_36 = arith.constant 0 : index
    %c0_37 = arith.constant 0 : index
    %58 = vector.load %arg3[%c1_35, %c0_36, %c0_37] : memref<3x128x128xf32, #tpu.memory_space<vmem>>, vector<1x128x128xf32>
    %59 = vector.shape_cast %58 : vector<1x128x128xf32> to vector<128x128xf32>
    %cst_38 = arith.constant dense<0.000000e+00> : vector<16x128xf32>
    %60 = tpu.matmul %48, %59, %cst_38 {dimension_numbers = #tpu.dot_dimension_numbers<[1], [0], [0], [1], [0, 0, 1, 1], [], []>} : vector<16x128xf32>, vector<128x128xf32>, vector<16x128xf32> -> vector<16x128xf32>
    %61 = arith.addf %57, %60 : vector<16x128xf32>
    %c2_39 = arith.constant 2 : index
    %c0_40 = arith.constant 0 : index
    %c0_41 = arith.constant 0 : index
    %62 = vector.load %arg3[%c2_39, %c0_40, %c0_41] : memref<3x128x128xf32, #tpu.memory_space<vmem>>, vector<1x128x128xf32>
    %63 = vector.shape_cast %62 : vector<1x128x128xf32> to vector<128x128xf32>
    %cst_42 = arith.constant dense<0.000000e+00> : vector<16x128xf32>
    %64 = tpu.matmul %54, %63, %cst_42 {dimension_numbers = #tpu.dot_dimension_numbers<[1], [0], [0], [1], [0, 0, 1, 1], [], []>} : vector<16x128xf32>, vector<128x128xf32>, vector<16x128xf32> -> vector<16x128xf32>
    %65 = arith.addf %61, %64 : vector<16x128xf32>
    %66 = vector.broadcast %23 : vector<1x128xf32> to vector<16x128xf32>
    %67 = arith.mulf %65, %66 : vector<16x128xf32>
    %68 = vector.broadcast %24 : vector<1x128xf32> to vector<16x128xf32>
    %69 = arith.addf %67, %68 : vector<16x128xf32>
    %70 = arith.addf %69, %25 : vector<16x128xf32>
    %cst_43 = arith.constant 0.000000e+00 : f32
    %71 = vector.broadcast %cst_43 : f32 to vector<16x128xf32>
    %72 = arith.maximumf %70, %71 : vector<16x128xf32>
    %c0_44 = arith.constant 0 : index
    %c0_45 = arith.constant 0 : index
    %73 = vector.load %arg8[%c0_44, %c0_45] : memref<16x128xf32, #tpu.memory_space<vmem>>, vector<16x128xf32>
    tpu.vector_store %arg8[%c0_44, %c0_45], %72 {strides = array<i32>} : memref<16x128xf32, #tpu.memory_space<vmem>>, vector<16x128xf32>,
    return
  }
  func.func @transform_0(%arg0: i32) -> (i32, i32) {
    %c0_i32 = arith.constant 0 : i32
    %c0_i32_0 = arith.constant 0 : i32
    return %arg0, %c0_i32 : i32, i32
  }
  func.func @transform_1(%arg0: i32) -> (i32, i32, i32) {
    %c0_i32 = arith.constant 0 : i32
    %c0_i32_0 = arith.constant 0 : i32
    %c0_i32_1 = arith.constant 0 : i32
    %c0_i32_2 = arith.constant 0 : i32
    return %c0_i32, %c0_i32_0, %c0_i32_1 : i32, i32, i32
  }
  func.func @transform_2(%arg0: i32) -> (i32, i32, i32) {
    %c0_i32 = arith.constant 0 : i32
    %c0_i32_0 = arith.constant 0 : i32
    %c0_i32_1 = arith.constant 0 : i32
    %c0_i32_2 = arith.constant 0 : i32
    return %c0_i32, %c0_i32_0, %c0_i32_1 : i32, i32, i32
  }
  func.func @transform_3(%arg0: i32) -> (i32, i32) {
    %c0_i32 = arith.constant 0 : i32
    %c0_i32_0 = arith.constant 0 : i32
    %c0_i32_1 = arith.constant 0 : i32
    return %c0_i32, %c0_i32_0 : i32, i32
  }
  func.func @transform_4(%arg0: i32) -> (i32, i32) {
    %c0_i32 = arith.constant 0 : i32
    %c0_i32_0 = arith.constant 0 : i32
    %c0_i32_1 = arith.constant 0 : i32
    return %c0_i32, %c0_i32_0 : i32, i32
  }
  func.func @transform_5(%arg0: i32) -> (i32, i32) {
    %c0_i32 = arith.constant 0 : i32
    %c0_i32_0 = arith.constant 0 : i32
    %c0_i32_1 = arith.constant 0 : i32
    return %c0_i32, %c0_i32_0 : i32, i32
  }
  func.func @transform_6(%arg0: i32) -> (i32, i32) {
    %c0_i32 = arith.constant 0 : i32
    %c0_i32_0 = arith.constant 0 : i32
    %c0_i32_1 = arith.constant 0 : i32
    return %c0_i32, %c0_i32_0 : i32, i32
  }
  func.func @transform_7(%arg0: i32) -> (i32, i32) {
    %c0_i32 = arith.constant 0 : i32
    %c0_i32_0 = arith.constant 0 : i32
    return %arg0, %c0_i32 : i32, i32
  }
}

</mosaic_0001>

<bundles_post_ra>
// kernel: tpu_custom_call.1
= control target key start
LH: loop header
LB: loop body
LE: loop exit
PB: predicated region body
PF: predicated region fallthrough
CT: control target
= control target key end

     0   :  { %12 = vsyncpa [#allocation3], 0  ;;  %s2238_s0 = inlined_call_operand.hbm [shape: f32[32,128], index: 0, kind: input, shape index: {}]   ;;  %s2239_s1 = inlined_call_operand.hbm [shape: f32[3,128,128], index: 1, kind: input, shape index: {}]   ;;  %s2240_s2 = inlined_call_operand.hbm [shape: f32[3,128,128], index: 2, kind: input, shape index: {}]   ;;  %s2241_s3 = inlined_call_operand.vmem [shape: f32[1,128], index: 3, kind: input, shape index: {}]   ;;  %s2242_s4 = inlined_call_operand.vmem [shape: f32[1,128], index: 4, kind: input, shape index: {}]   ;;  %s2243_s5 = inlined_call_operand.vmem [shape: f32[1,128], index: 5, kind: input, shape index: {}]   ;;  %s2244_s6 = inlined_call_operand.vmem [shape: f32[1,128], index: 6, kind: input, shape index: {}]   ;;  %s2245_s7 = inlined_call_operand.hbm [shape: f32[32,128], index: 7, kind: output, shape index: {}]  }
   0x1   :  { %14 = vsyncpa [#allocation3 + $0x1], 0 }
   0x2   :  { %15 = vsyncpa [#allocation6], 0 }
   0x3   :  { %16 = vsyncpa [#allocation4], 0 }
   0x4   :  { %18 = vsyncpa [#allocation4 + $0x1], 0  ;;  %s1914_s24 = smov 0   ;;  %s1916_s25 = smov 0  }
   0x5   :  { %s1918_s26 = smov 0   ;;  %s1920_s27 = smov 0  }
   0x6 LB: > { %s1935_s28 = sadd.s32 4294967295, %s1864_s27   ;;  %s1091_s29 = sadd.s32 4294967294, %s1864_s27   ;;  %s1864_s27 = sphi %s1920_s27, %s2271_s27   ;;  %s1860_s26 = sphi %s1918_s26, %s2270_s26   ;;  %s1856_s25 = sphi %s1916_s25, %s2269_s25   ;;  %s1852_s24 = sphi %s1914_s24, %s2268_s24  }
   0x7   : > { %p44_p0 = scmp.ne.s32.totalorder %s1856_s25, %s1852_s24  ;;  %p2246_p1 = scmp.eq.s32.totalorder %s1935_s28, 0 }
   0x8   : > { %p200_p3 = scmp.eq.s32.totalorder %s1091_s29, 1  ;;  %p1092_p5 = scmp.ge.s32.totalorder %s1864_s27, 1 }
   0x9   : > { %p1944_p4 = por %p2246_p1, %p44_p0  ;;  %p207_p7 = scmp.lt.s32.totalorder %s1864_s27, 3 }
   0xa   : > { %p1949_p6 = por %p200_p3, %p44_p0  ;;  %s1866_s10 = smov [#allocation5]  }
   0xb   : > { %s2250_s30 = scalar_select %p1944_p4, 1, 0 }
   0xc   : > { %s2251_s8 = scalar_select %p1949_p6, 1, 0 }
   0xd   : > { %p1954_p8 = pnand %p1092_p5, %p207_p7  ;;  %s219_s11 = sshll.u32 %s1866_s10, 4  ;;  %s1958_s11 = int_to_ptr.vmem [resolvable:$true] %s219_s11 }
   0xe   : > { %s1867_s13 = smov [#allocation7]   ;;  %s1708_s17 = scalar_lea.hbm %s2239_s1, 6144 }
   0xf   : > { %p1649_p9 = pneg %p1954_p8  ;;  %s232_s14 = sshll.u32 %s1867_s13, 4  ;;  %s1969_s14 = int_to_ptr.vmem [resolvable:$true] %s232_s14 }
  0x10   : > { %p1709_p12 = scmp.ne.s32.totalorder %s2239_s1, %s1708_s17  ;;  %p1715_p5 = scmp.lt.u32.totalorder %s1708_s17, %s2239_s1 }
  0x11   : > { %p1965_p11 = pnand %p1649_p9, %p2246_p1 }
  0x13   : > { %p1710_p13 = pneg %p1965_p11 }
  0x15   : > { %p1711_p0 = pnand %p1710_p13, %p1709_p12 }
  0x17   : > { %p1712_p3 = pneg %p1711_p0 }
  0x19   : > { %p1717_p7 = pnand %p1715_p5, %p1712_p3 }
  0x1b   : > { %1720 = shalt.err (!%p1717_p7)
}
  0x1c   : > { %s1721_s22 = scalar_lea.vmem %s1958_s11, 6144  ;;  %p1729_p2 = scmp.lt.s32.totalorder %s1958_s11, %s1958_s11 }
  0x1d   : > { %p1722_p9 = scmp.ne.s32.totalorder %s1958_s11, %s1721_s22  ;;  %p1730_p12 = scmp.lt.s32.totalorder %s1721_s22, %s1721_s22 }
  0x1f   : > { %p1724_p10 = pnand %p1722_p9, %p1710_p13  ;;  %p1731_p0 = por %p1730_p12, %p1729_p2 }
  0x21   : > { %p1725_p1 = pneg %p1724_p10 }
  0x23   : > { %p1732_p6 = pnand %p1731_p0, %p1725_p1 }
  0x25   : > { %1735 = shalt.err (!%p1732_p6)
}
  0x26   : > { %s2247_s23 = smov 128   ;;  %s1869_s29 = smov 8  }
  0x27   : > { %1652 = dma.hbm_to_vmem [thread:$0]  (!%p1965_p11), %s2239_s1, 6144, %s1958_s11, [#allocation6], %s2247_s23, %s2247_s23, %s1869_s29  }
  0x28   : > { %s1736_s17 = scalar_lea.hbm %s2240_s2, 6144 }
  0x29   : > { %p1737_p1 = scmp.ne.s32.totalorder %s2240_s2, %s1736_s17  ;;  %p1743_p10 = scmp.lt.u32.totalorder %s1736_s17, %s2240_s2 }
  0x2b   : > { %p1739_p2 = pnand %p1737_p1, %p1710_p13 }
  0x2d   : > { %p1740_p6 = pneg %p1739_p2 }
  0x2f   : > { %p1745_p3 = pnand %p1743_p10, %p1740_p6 }
  0x31   : > { %1748 = shalt.err (!%p1745_p3)
}
  0x32   : > { %s1749_s11 = scalar_lea.vmem %s1969_s14, 6144  ;;  %p1757_p12 = scmp.lt.s32.totalorder %s1969_s14, %s1969_s14 }
  0x33   : > { %p1750_p5 = scmp.ne.s32.totalorder %s1969_s14, %s1749_s11  ;;  %p1758_p0 = scmp.lt.s32.totalorder %s1749_s11, %s1749_s11 }
  0x35   : > { %p1752_p7 = pnand %p1750_p5, %p1710_p13  ;;  %p1759_p1 = por %p1758_p0, %p1757_p12 }
  0x37   : > { %p1753_p9 = pneg %p1752_p7 }
  0x39   : > { %p1760_p2 = pnand %p1759_p1, %p1753_p9 }
  0x3b   : > { %1763 = shalt.err (!%p1760_p2)
}
  0x3c   : > { %1655 = dma.hbm_to_vmem [thread:$0]  (!%p1965_p11), %s2240_s2, 6144, %s1969_s14, [#allocation6], %s2247_s23, %s2247_s23, %s1869_s29  }
  0x3d   : > { %s2030_s12 = sadd.s32 1, %s1864_s27   ;;  %s31_s13 = sadd.s32 1, %s1860_s26 }
  0x3e   : > { %s28_s15 = ssub.s32 %s1864_s27, %s2030_s12  ;;  %p38_p13 = scmp.ne.s32.totalorder %s1860_s26, %s1856_s25 }
  0x3f   : > { %p29_p6 = scmp.eq.s32.totalorder %s28_s15, 0  ;;  %p39_p10 = scmp.eq.s32.totalorder %s1864_s27, 0 }
  0x40   : > { %p2254_p3 = scmp.eq.s32.totalorder %s1935_s28, 1  ;;  %p1666_p7 = scmp.lt.s32.totalorder %s1864_s27, 2 }
  0x41   : > { %s2046_s17 = scalar_select %p29_p6, %s1860_s26, %s31_s13  }
  0x42   : > { %p2040_p5 = por %p2254_p3, %p38_p13  ;;  %p40_p9 = por %p39_p10, %p38_p13 }
  0x43   : > { %s258_s18 = sand.u32 1, %s1860_s26   ;;  %s1117_s14 = sshll.u32 %s1864_s27, 8 }
  0x44   : > { %s2255_s16 = scalar_select %p2040_p5, 1, 0 }
  0x45   : > { %s1096_s19 = sshll.u32 %s258_s18, 4  ;;  %s2053_s11 = scalar_lea.hbm %s2238_s0, %s1117_s14 }
  0x46   : > { %s262_s22 = scalar_lea.vmem [#allocation2], %s1096_s19  ;;  %p2057_p11 = pnand %p1666_p7, %p40_p9 }
  0x47   : > { %s269_s10 = sshll.u32 %s262_s22, 4  ;;  %s2061_s15 = scalar_lea.sflag [#allocation3], %s258_s18  ;;  %s2055_s10 = int_to_ptr.vmem [resolvable:$true] %s269_s10 }
  0x48   : > { %s1764_s23 = scalar_lea.hbm %s2053_s11, 256  ;;  %p1766_p0 = pneg %p2057_p11 }
  0x49   : > { %p1765_p12 = scmp.ne.s32.totalorder %s2053_s11, %s1764_s23  ;;  %s1769_s20 = scalar_lea.hbm %s2238_s0, 512 }
  0x4a   : > { %p1770_p13 = scmp.lt.u32.totalorder %s2053_s11, %s2238_s0  ;;  %p1771_p6 = scmp.lt.u32.totalorder %s1769_s20, %s1764_s23 }
  0x4b   : > { %p1767_p1 = pnand %p1766_p0, %p1765_p12  ;;  %p1773_p3 = scmp.lt.u32.totalorder %s1764_s23, %s2053_s11 }
  0x4c   : > { %p1772_p10 = por %p1771_p6, %p1770_p13 }
  0x4d   : > { %p1768_p2 = pneg %p1767_p1 }
  0x4e   : > { %p1774_p7 = por %p1773_p3, %p1772_p10 }
  0x50   : > { %p1775_p9 = pnand %p1774_p7, %p1768_p2 }
  0x52   : > { %1778 = shalt.err (!%p1775_p9)
}
  0x53   : > { %s1779_s18 = scalar_lea.vmem %s2055_s10, 256  ;;  %s1870_s19 = smov [#allocation2]  }
  0x54   : > { %p1780_p12 = scmp.ne.s32.totalorder %s2055_s10, %s1779_s18  ;;  %s1784_s14 = sshll.u32 %s1870_s19, 4  ;;  %s1785_s14 = int_to_ptr.vmem [resolvable:$false] %s1784_s14 }
  0x55   : > { %s1786_s21 = scalar_lea.vmem %s1785_s14, 512  ;;  %p1787_p4 = scmp.lt.s32.totalorder %s2055_s10, %s1785_s14 }
  0x56   : > { %p1782_p1 = pnand %p1780_p12, %p1766_p0  ;;  %p1788_p13 = scmp.lt.s32.totalorder %s1786_s21, %s1779_s18 }
  0x58   : > { %p1783_p5 = pneg %p1782_p1  ;;  %p1789_p6 = por %p1788_p13, %p1787_p4 }
  0x5a   : > { %p1790_p10 = pnand %p1789_p6, %p1783_p5 }
  0x5c   : > { %1793 = shalt.err (!%p1790_p10)
}
  0x5d   : > { %s2257_s23 = smov 128   ;;  %281 = sbr.rel (%p1954_p8) target bundleno = 723 (0x2d3), region = 48 }
  0x5e   : > { %1659 = dma.hbm_to_vmem [thread:$0]  (!%p2057_p11), %s2053_s11, 256, %s2055_s10, %s2061_s15, %s2257_s23, %s2257_s23, %s1869_s29  }
  0x5f   : > { %s2095_s20 = sand.u32 (!%p1954_p8), 1, %s1856_s25   ;;  %p2258_p4 = scmp.ne.s32.totalorder (!%p1954_p8), %s2250_s30, 0 }
  0x60   : > { %s1100_s22 = sshll.u32 (!%p1954_p8), %s2095_s20, 4  ;;  %s284_s18 = scalar_lea.sflag (!%p1954_p8), [#allocation3], %s2095_s20 }
  0x61   : > { %s2101_s13 = scalar_lea.vmem (!%p1954_p8), [#allocation2], %s1100_s22 }
  0x64   : > { %1839 = dma.done.wait (%p2258_p4), %s284_s18, 256  }
  0x65   : > { %1841 = vsyncadd (%p2258_p4), %s284_s18, 4294967040  ;;  %p2259_p5 = scmp.eq.s32.totalorder %s1935_s28, 0 }
  0x67   : > { %1843 = dma.done.wait (%p2259_p5), [#allocation6], 12288   ;;  %p2260_p8 = pmov %p2259_p5 }
  0x68   : > { %v396_v0 = vld [vmem:[#allocation5 + $0x80] sm:$0xff]  ;;  %v397_v1 = vld [vmem:[#allocation5 + $0x88] sm:$0xff]  ;;  %v398_v2 = vld [vmem:[#allocation5 + $0x90] sm:$0xff]  ;;  %v328_v30 = vlaneseq  ;;  %s325_s21 = scalar_lea.vmem [#allocation8], %s1100_s22  ;;  %s1118_s18 = sshll.u32 %s1935_s28, 8 }
  0x69   : > { %1845 = vsyncadd (%p2260_p8), [#allocation6], 4294955008  ;;  %v1437_v3 = vpack.c.bf16 %v397_v1, %v396_v0  ;;  %v399_v4 = vld [vmem:[#allocation5 + $0x98] sm:$0xff]  ;;  %v400_v6 = vld [vmem:[#allocation5 + $0xa0] sm:$0xff]  ;;  %s999_s23 = sshll.u32 %s325_s21, 4  ;;  %s2194_s9 = scalar_lea.hbm %s2245_s7, %s1118_s18  ;;  %s2188_s23 = int_to_ptr.vmem [resolvable:$true] %s999_s23 }
  0x6a   : > { %v1441_v5 = vpack.c.bf16 %v399_v4, %v398_v2  ;;  %v401_v7 = vld [vmem:[#allocation5 + $0xa8] sm:$0xff]  ;;  %v2112_v9 = vld [vmem:[%s2101_s13] sm:$0xff]  ;;  %v403_v11 = vld [vmem:[#allocation5 + $0xb8] sm:$0xff]  ;;  %v2115_v37 = vshrl.u32 %v328_v30, 7  ;;  %s986_s22 = scalar_lea.sflag [#allocation4], %s2095_s20  ;;  %s1794_s28 = scalar_lea.vmem %s2188_s23, 256 }
  0x6b   : > { %1438 = vmatprep.subr.bf16.mxu0 %v1437_v3  ;;  %v1445_v8 = vpack.c.bf16 %v401_v7, %v400_v6  ;;  %v402_v10 = vld [vmem:[#allocation5 + $0xb0] sm:$0xff]  ;;  %1259 = vmatprep.mubr.f32.mxu0 %v2112_v9  ;;  %v404_v13 = vld [vmem:[#allocation5 + $0xc0] sm:$0xff]  ;;  %v405_v14 = vld [vmem:[#allocation5 + $0xc8] sm:$0xff]  ;;  %v365_v44 = vrot.slane %v2112_v9, 7  ;;  %p1795_p11 = scmp.ne.s32.totalorder %s2188_s23, %s1794_s28  ;;  %p2265_p0 = scmp.ne.s32.totalorder %s2255_s16, 0 }
  0x6c   : > { %1440 = vmatpush3.bf16.msra.mxu0 %v1437_v3  ;;  %v1449_v12 = vpack.c.bf16 %v403_v11, %v402_v10  ;;  %v1453_v15 = vpack.c.bf16 %v405_v14, %v404_v13  ;;  %v406_v16 = vld [vmem:[#allocation5 + $0xd0] sm:$0xff]  ;;  %v407_v17 = vld [vmem:[#allocation5 + $0xd8] sm:$0xff]  ;;  %v703_v18 = vld [vmem:[#allocation7 + $0x80] sm:$0xff]  ;;  %v335_v47 = vand.u32 15, %v2115_v37  ;;  %vm367_vm0 = vcmp.lt.s32.totalorder %v2115_v37, 1  ;;  %s1871_s29 = smov [#allocation8]  }
  0x6d   : > { %1442 = vmatprep.subr.bf16.mxu0 %v1441_v5  ;;  %v1457_v19 = vpack.c.bf16 %v407_v17, %v406_v16  ;;  %v704_v20 = vld [vmem:[#allocation7 + $0x88] sm:$0xff]  ;;  %v705_v21 = vld [vmem:[#allocation7 + $0x90] sm:$0xff]  ;;  %v706_v22 = vld [vmem:[#allocation7 + $0x98] sm:$0xff]  ;;  %vm374_vm2 = vcmp.lt.s32.totalorder %v2115_v37, 7  ;;  %p1796_p2 = pnand %p1795_p11, %p2265_p0  ;;  %s1798_s11 = sshll.u32 %s1871_s29, 4  ;;  %s1799_s11 = int_to_ptr.vmem [resolvable:$false] %s1798_s11 }
  0x6e   : > { %v408_v23 = vld [vmem:[#allocation5 + $0xe0] sm:$0xff]  ;;  %v409_v24 = vld [vmem:[#allocation5 + $0xe8] sm:$0xff]  ;;  %v1533_v25 = vpack.c.bf16 %v704_v20, %v703_v18  ;;  %v1537_v26 = vpack.c.bf16 %v706_v22, %v705_v21  ;;  %v410_v31 = vld [vmem:[#allocation5 + $0xf0] sm:$0xff]  ;;  %vm2124_vm1 = vcmp.ne.s32.totalorder %v335_v47, 0  ;;  %s1800_s10 = scalar_lea.vmem %s1799_s11, 512  ;;  %p1801_p7 = scmp.lt.s32.totalorder %s2188_s23, %s1799_s11 }
  0x6f   : > { %v707_v27 = vld [vmem:[#allocation7 + $0xa0] sm:$0xff]  ;;  %v708_v28 = vld [vmem:[#allocation7 + $0xa8] sm:$0xff]  ;;  %v1461_v29 = vpack.c.bf16 %v409_v24, %v408_v23  ;;  %v411_v32 = vld [vmem:[#allocation5 + $0xf8] sm:$0xff]  ;;  %p1797_p3 = pneg %p1796_p2  ;;  %p1802_p9 = scmp.lt.s32.totalorder %s1800_s10, %s1794_s28 }
  0x70   : > { %1444 = vmatpush3.bf16.msra.mxu0 %v1441_v5  ;;  %1534 = vmatprep.subr.bf16.mxu1 %v1533_v25  ;;  %v1541_v33 = vpack.c.bf16 %v708_v28, %v707_v27  ;;  %v709_v34 = vld [vmem:[#allocation7 + $0xb0] sm:$0xff]  ;;  %v710_v35 = vld [vmem:[#allocation7 + $0xb8] sm:$0xff]  ;;  %v1465_v36 = vpack.c.bf16 %v411_v32, %v410_v31  ;;  %v379_v38 = vld [vmem:[#allocation5] sm:$0xff] }
  0x71   : > { %1446 = vmatprep.subr.bf16.mxu0 %v1445_v8  ;;  %1536 = vmatpush3.bf16.msra.mxu1 %v1533_v25  ;;  %v380_v39 = vld [vmem:[#allocation5 + $0x8] sm:$0xff]  ;;  %v1545_v40 = vpack.c.bf16 %v710_v35, %v709_v34  ;;  %v711_v41 = vld [vmem:[#allocation7 + $0xc0] sm:$0xff]  ;;  %v381_v48 = vld [vmem:[#allocation5 + $0x10] sm:$0xff]  ;;  %p1803_p12 = por %p1802_p9, %p1801_p7 }
  0x72   : > { %1538 = vmatprep.subr.bf16.mxu1 %v1537_v26  ;;  %v712_v42 = vld [vmem:[#allocation7 + $0xc8] sm:$0xff]  ;;  %v1469_v45 = vpack.c.bf16 %v380_v39, %v379_v38  ;;  %v382_v49 = vld [vmem:[#allocation5 + $0x18] sm:$0xff]  ;;  %v713_v51 = vld [vmem:[#allocation7 + $0xd0] sm:$0xff] }
  0x73   : > { %v2118_v43 = vld [vmem:[%s2101_s13 + $0x8] sm:$0xff]  ;;  %v1549_v50 = vpack.c.bf16 %v712_v42, %v711_v41  ;;  %v1473_v53 = vpack.c.bf16 %v382_v49, %v381_v48  ;;  %v383_v56 = vld [vmem:[#allocation5 + $0x20] sm:$0xff]  ;;  %v385_v60 = vld [vmem:[#allocation5 + $0x30] sm:$0xff]  ;;  %p1804_p1 = pnand %p1803_p12, %p1797_p3 }
  0x74   : > { %1448 = vmatpush3.bf16.msra.mxu0 %v1445_v8  ;;  %v366_v46 = vrot.slane %v2118_v43, 7  ;;  %v714_v52 = vld [vmem:[#allocation7 + $0xd8] sm:$0xff]  ;;  %v384_v57 = vld [vmem:[#allocation5 + $0x28] sm:$0xff]  ;;  %v387_v63 = vld [vmem:[#allocation5 + $0x40] sm:$0xff]  ;;  %v373_v16 = vrot.slane %v2118_v43, 1 }
  0x75   : > { %1450 = vmatprep.subr.bf16.mxu0 %v1449_v12  ;;  %1540 = vmatpush3.bf16.msra.mxu1 %v1537_v26  ;;  %v1553_v58 = vpack.c.bf16 %v714_v52, %v713_v51  ;;  %v1477_v59 = vpack.c.bf16 %v384_v57, %v383_v56  ;;  %v386_v61 = vld [vmem:[#allocation5 + $0x38] sm:$0xff]  ;;  %v388_v0 = vld [vmem:[#allocation5 + $0x48] sm:$0xff]  ;;  %v389_v2 = vld [vmem:[#allocation5 + $0x50] sm:$0xff] }
  0x76   : > { %1542 = vmatprep.subr.bf16.mxu1 %v1541_v33  ;;  %v369_v55 = vsel %vm367_vm0, %v366_v46, %v365_v44  ;;  %v1481_v62 = vpack.c.bf16 %v386_v61, %v385_v60  ;;  %v1485_v1 = vpack.c.bf16 %v388_v0, %v387_v63  ;;  %v390_v3 = vld [vmem:[#allocation5 + $0x58] sm:$0xff]  ;;  %v391_v5 = vld [vmem:[#allocation5 + $0x60] sm:$0xff]  ;;  %v392_v6 = vld [vmem:[#allocation5 + $0x68] sm:$0xff] }
  0x77   : > { %v1489_v4 = vpack.c.bf16 %v390_v3, %v389_v2  ;;  %v1493_v7 = vpack.c.bf16 %v392_v6, %v391_v5  ;;  %v393_v8 = vld [vmem:[#allocation5 + $0x70] sm:$0xff]  ;;  %v394_v10 = vld [vmem:[#allocation5 + $0x78] sm:$0xff]  ;;  %v564_v13 = vld [vmem:[#allocation5 + $0x108] sm:$0xff] }
  0x78   : > { %1452 = vmatpush3.bf16.msra.mxu0 %v1449_v12  ;;  %v1497_v11 = vpack.c.bf16 %v394_v10, %v393_v8  ;;  %v563_v12 = vld [vmem:[#allocation5 + $0x100] sm:$0xff]  ;;  %v565_v17 = vld [vmem:[#allocation5 + $0x110] sm:$0xff]  ;;  %v566_v18 = vld [vmem:[#allocation5 + $0x118] sm:$0xff] }
  0x79   : > { %1454 = vmatprep.subr.bf16.mxu0 %v1453_v15  ;;  %1544 = vmatpush3.bf16.msra.mxu1 %v1541_v33  ;;  %v1501_v14 = vpack.c.bf16 %v564_v13, %v563_v12  ;;  %v1505_v20 = vpack.c.bf16 %v566_v18, %v565_v17  ;;  %v567_v22 = vld [vmem:[#allocation5 + $0x120] sm:$0xff]  ;;  %v568_v23 = vld [vmem:[#allocation5 + $0x128] sm:$0xff]  ;;  %v569_v25 = vld [vmem:[#allocation5 + $0x130] sm:$0xff] }
  0x7a   : > { %1546 = vmatprep.subr.bf16.mxu1 %v1545_v40  ;;  %v1509_v24 = vpack.c.bf16 %v568_v23, %v567_v22  ;;  %v570_v26 = vld [vmem:[#allocation5 + $0x138] sm:$0xff]  ;;  %v571_v28 = vld [vmem:[#allocation5 + $0x140] sm:$0xff]  ;;  %v573_v31 = vld [vmem:[#allocation5 + $0x150] sm:$0xff] }
  0x7b   : > { %v1513_v27 = vpack.c.bf16 %v570_v26, %v569_v25  ;;  %v574_v32 = vld [vmem:[#allocation5 + $0x158] sm:$0xff]  ;;  %v575_v34 = vld [vmem:[#allocation5 + $0x160] sm:$0xff]  ;;  %v576_v35 = vld [vmem:[#allocation5 + $0x168] sm:$0xff] }
  0x7c   : > { %1456 = vmatpush3.bf16.msra.mxu0 %v1453_v15  ;;  %v372_v15 = vrot.slane %v2112_v9, 1  ;;  %v1521_v33 = vpack.c.bf16 %v574_v32, %v573_v31  ;;  %v577_v38 = vld [vmem:[#allocation5 + $0x170] sm:$0xff]  ;;  %v578_v39 = vld [vmem:[#allocation5 + $0x178] sm:$0xff]  ;;  %v716_v47 = vld [vmem:[#allocation7 + $0xe8] sm:$0xff] }
  0x7d   : > { %1458 = vmatprep.subr.bf16.mxu0 %v1457_v19  ;;  %1548 = vmatpush3.bf16.msra.mxu1 %v1545_v40  ;;  %v330_v40 = vadd.s32 8, %v2115_v37  ;;  %v1529_v41 = vpack.c.bf16 %v578_v39, %v577_v38  ;;  %v717_v49 = vld [vmem:[#allocation7 + $0xf0] sm:$0xff]  ;;  %v686_v52 = vld [vmem:[#allocation7] sm:$0xff]  ;;  %v691_v10 = vld [vmem:[#allocation7 + $0x28] sm:$0xff] }
  0x7e   : > { %1550 = vmatprep.subr.bf16.mxu1 %v1549_v50  ;;  %v375_v21 = vsel %vm374_vm2, %v372_v15, %v373_v16  ;;  %v1106_v56 = vld [vmem:[%s2241_s3] ss:$0 sm:$0xff]  ;;  %v688_v0 = vld [vmem:[#allocation7 + $0x10] sm:$0xff]  ;;  %v693_v18 = vld [vmem:[#allocation7 + $0x38] sm:$0xff] }
  0x7f   : > { %v342_v42 = vand.u32 15, %v330_v40  ;;  %v1107_v57 = vld [vmem:[%s2242_s4] ss:$0 sm:$0xff]  ;;  %v692_v17 = vld [vmem:[#allocation7 + $0x30] sm:$0xff]  ;;  %v699_v54 = vld [vmem:[#allocation7 + $0x68] sm:$0xff] }
  0x80   : > { %1460 = vmatpush3.bf16.msra.mxu0 %v1457_v19  ;;  %v368_v19 = vsel %vm367_vm0, %v365_v44, %v366_v46  ;;  %v715_v46 = vld [vmem:[#allocation7 + $0xe0] sm:$0xff]  ;;  %v696_v23 = vld [vmem:[#allocation7 + $0x50] sm:$0xff]  ;;  %v871_v31 = vld [vmem:[#allocation7 + $0x108] sm:$0xff] }
  0x81   : > { %1462 = vmatprep.subr.bf16.mxu0 %v1461_v29  ;;  %1552 = vmatpush3.bf16.msra.mxu1 %v1549_v50  ;;  %vm2149_vm3 = vcmp.ne.s32.totalorder %v342_v42, 15  ;;  %v1557_v48 = vpack.c.bf16 %v716_v47, %v715_v46  ;;  %v718_v50 = vld [vmem:[#allocation7 + $0xf8] sm:$0xff]  ;;  %v690_v8 = vld [vmem:[#allocation7 + $0x20] sm:$0xff]  ;;  %v875_v38 = vld [vmem:[#allocation7 + $0x128] sm:$0xff] }
  0x82   : > { %1554 = vmatprep.subr.bf16.mxu1 %v1553_v58  ;;  %v1561_v51 = vpack.c.bf16 %v718_v50, %v717_v49  ;;  %v698_v25 = vld [vmem:[#allocation7 + $0x60] sm:$0xff]  ;;  %v876_v40 = vld [vmem:[#allocation7 + $0x130] sm:$0xff]  ;;  %v879_v46 = vld [vmem:[#allocation7 + $0x148] sm:$0xff] }
  0x83   : > { %v1589_v26 = vpack.c.bf16 %v699_v54, %v698_v25  ;;  %v881_v49 = vld [vmem:[#allocation7 + $0x158] sm:$0xff] }
  0x84   : > { %1464 = vmatpush3.bf16.msra.mxu0 %v1461_v29  ;;  %v572_v29 = vld [vmem:[#allocation5 + $0x148] sm:$0xff] }
  0x85   : > { %1466 = vmatprep.subr.bf16.mxu0 %v1465_v36  ;;  %1556 = vmatpush3.bf16.msra.mxu1 %v1553_v58  ;;  %v1517_v30 = vpack.c.bf16 %v572_v29, %v571_v28  ;;  %v701_v28 = vld [vmem:[#allocation7 + $0x78] sm:$0xff] }
  0x86   : > { %1558 = vmatprep.subr.bf16.mxu1 %v1557_v48 }
  0x88   : > { %1468 = vmatpush3.bf16.msra.mxu0 %v1465_v36  ;;  %v1525_v36 = vpack.c.bf16 %v576_v35, %v575_v34  ;;  %v873_v34 = vld [vmem:[#allocation7 + $0x118] sm:$0xff] }
  0x89   : > { %1470 = vmatprep.subr.bf16.mxu0 %v1469_v45  ;;  %1560 = vmatpush3.bf16.msra.mxu1 %v1557_v48  ;;  %v880_v48 = vld [vmem:[#allocation7 + $0x150] sm:$0xff] }
  0x8a   : > { %1562 = vmatprep.subr.bf16.mxu1 %v1561_v51  ;;  %v1617_v50 = vpack.c.bf16 %v881_v49, %v880_v48 }
  0x8b   : > { %1260 = vmatmul.mubr.f32.vlgmr.msra.gmra.mrb[0].mxu0 %v2118_v43 }
  0x8c   : > { %1472 = vmatpush3.bf16.msra.mxu0 %v1469_v45  ;;  %1294 = vmatprep.mubr.msk.f32.mxu0 %vm2124_vm1, %v369_v55  ;;  %v376_v45 = vsel %vm374_vm2, %v373_v16, %v372_v15  ;;  %v1573_v16 = vpack.c.bf16 %v691_v10, %v690_v8 }
  0x8d   : > { %1474 = vmatprep.subr.bf16.mxu0 %v1473_v53  ;;  %1564 = vmatpush3.bf16.msra.mxu1 %v1561_v51  ;;  %v882_v51 = vld [vmem:[#allocation7 + $0x160] sm:$0xff] }
  0x90   : > { %1476 = vmatpush3.bf16.msra.mxu0 %v1473_v53  ;;  %v687_v53 = vld [vmem:[#allocation7 + $0x8] sm:$0xff] }
  0x91   : > { %1478 = vmatprep.subr.bf16.mxu0 %v1477_v59  ;;  %v1565_v55 = vpack.c.bf16 %v687_v53, %v686_v52  ;;  %v883_v52 = vld [vmem:[#allocation7 + $0x168] sm:$0xff] }
  0x92   : > { %v1621_v53 = vpack.c.bf16 %v883_v52, %v882_v51 }
  0x93   : > { %1566 = vmatprep.subr.bf16.mxu1 %v1565_v55 }
  0x94   : > { %1480 = vmatpush3.bf16.msra.mxu0 %v1477_v59 }
  0x95   : > { %1482 = vmatprep.subr.bf16.mxu0 %v1481_v62 }
  0x98   : > { %1484 = vmatpush3.bf16.msra.mxu0 %v1481_v62 }
  0x99   : > { %1486 = vmatprep.subr.bf16.mxu0 %v1485_v1 }
  0x9c   : > { %1488 = vmatpush3.bf16.msra.mxu0 %v1485_v1  ;;  %v689_v1 = vld [vmem:[#allocation7 + $0x18] sm:$0xff] }
  0x9d   : > { %1490 = vmatprep.subr.bf16.mxu0 %v1489_v4  ;;  %v1569_v5 = vpack.c.bf16 %v689_v1, %v688_v0 }
  0xa0   : > { %1492 = vmatpush3.bf16.msra.mxu0 %v1489_v4 }
  0xa1   : > { %1494 = vmatprep.subr.bf16.mxu0 %v1493_v7 }
  0xa4   : > { %1496 = vmatpush3.bf16.msra.mxu0 %v1493_v7 }
  0xa5   : > { %1498 = vmatprep.subr.bf16.mxu0 %v1497_v11 }
  0xa8   : > { %1500 = vmatpush3.bf16.msra.mxu0 %v1497_v11 }
  0xa9   : > { %1502 = vmatprep.subr.bf16.mxu0 %v1501_v14 }
  0xab   : > { %1295 = vmatmul.mubr.f32.vlgmr.msra.gmra.mrb[0].mxu0 %v368_v19  ;;  %v1577_v19 = vpack.c.bf16 %v693_v18, %v692_v17 }
  0xac   : > { %1504 = vmatpush3.bf16.msra.mxu0 %v1501_v14  ;;  %1329 = vmatprep.mubr.f32.mxu0 %v375_v21  ;;  %v695_v21 = vld [vmem:[#allocation7 + $0x48] sm:$0xff] }
  0xad   : > { %1506 = vmatprep.subr.bf16.mxu0 %v1505_v20 }
  0xb0   : > { %1508 = vmatpush3.bf16.msra.mxu0 %v1505_v20  ;;  %v694_v20 = vld [vmem:[#allocation7 + $0x40] sm:$0xff] }
  0xb1   : > { %1510 = vmatprep.subr.bf16.mxu0 %v1509_v24  ;;  %v1581_v22 = vpack.c.bf16 %v695_v21, %v694_v20 }
  0xb4   : > { %1512 = vmatpush3.bf16.msra.mxu0 %v1509_v24  ;;  %v697_v24 = vld [vmem:[#allocation7 + $0x58] sm:$0xff] }
  0xb5   : > { %1514 = vmatprep.subr.bf16.mxu0 %v1513_v27  ;;  %v1585_v37 = vpack.c.bf16 %v697_v24, %v696_v23 }
  0xb8   : > { %1516 = vmatpush3.bf16.msra.mxu0 %v1513_v27  ;;  %v700_v27 = vld [vmem:[#allocation7 + $0x70] sm:$0xff] }
  0xb9   : > { %1518 = vmatprep.subr.bf16.mxu0 %v1517_v30  ;;  %v1593_v29 = vpack.c.bf16 %v701_v28, %v700_v27 }
  0xbc   : > { %1520 = vmatpush3.bf16.msra.mxu0 %v1517_v30  ;;  %v870_v30 = vld [vmem:[#allocation7 + $0x100] sm:$0xff] }
  0xbd   : > { %1522 = vmatprep.subr.bf16.mxu0 %v1521_v33  ;;  %v1597_v32 = vpack.c.bf16 %v871_v31, %v870_v30 }
  0xc0   : > { %1524 = vmatpush3.bf16.msra.mxu0 %v1521_v33  ;;  %v872_v33 = vld [vmem:[#allocation7 + $0x110] sm:$0xff] }
  0xc1   : > { %1526 = vmatprep.subr.bf16.mxu0 %v1525_v36  ;;  %v1601_v35 = vpack.c.bf16 %v873_v34, %v872_v33 }
  0xc4   : > { %1528 = vmatpush3.bf16.msra.mxu0 %v1525_v36  ;;  %v874_v36 = vld [vmem:[#allocation7 + $0x120] sm:$0xff] }
  0xc5   : > { %1530 = vmatprep.subr.bf16.mxu0 %v1529_v41  ;;  %v1605_v39 = vpack.c.bf16 %v875_v38, %v874_v36 }
  0xc8   : > { %1532 = vmatpush3.bf16.msra.mxu0 %v1529_v41  ;;  %v877_v41 = vld [vmem:[#allocation7 + $0x138] sm:$0xff] }
  0xc9   : > { %v1609_v42 = vpack.c.bf16 %v877_v41, %v876_v40 }
  0xcb   : > { %1330 = vmatmul.mubr.msk.f32.vlgmr.msra.gmra.mrb[0].mxu0 %vm2149_vm3, %v376_v45  ;;  %v878_v45 = vld [vmem:[#allocation7 + $0x140] sm:$0xff] }
  0xcc   : > { %v1613_v47 = vpack.c.bf16 %v879_v46, %v878_v45 }
 0x19e   : > { %v1331_v58 = vpop.f32.mrb[0].mxu0 }
 0x19f   : > { %v663_v59 = vmul.f32 %v1331_v58, %v1106_v56  ;;  %v645_v60 = vpop.f32.mrb[1].mxu0  ;;  %v1110_v58 = vld [vmem:[%s2243_s5] ss:$0 sm:$0xff] }
 0x1a0   : > { %v662_v61 = vmul.f32 %v1106_v56, %v645_v60  ;;  %v885_v56 = vld [vmem:[#allocation7 + $0x178] sm:$0xff] }
 0x1a1   : > { %v671_v62 = vadd.f32 %v1107_v57, %v663_v59  ;;  %v1111_v59 = vld [vmem:[%s2244_s6] ss:$0 sm:$0xff] }
 0x1a2   : > { %v670_v63 = vadd.f32 %v1107_v57, %v662_v61 }
 0x1a3   : > { %v673_v2 = vmax.f32 %v671_v62, 0.0 }
 0x1a4   : > { %v672_v3 = vmax.f32 %v670_v63, 0.0 }
 0x1a5   : > { %v675_v4 = vrot.slane %v673_v2, 7  ;;  %v681_v6 = vrot.slane %v673_v2, 1 }
 0x1a6   : > { %v674_v7 = vrot.slane %v672_v3, 7  ;;  %1364 = vmatprep.mubr.f32.mxu1 %v672_v3  ;;  %v680_v11 = vrot.slane %v672_v3, 1 }
 0x1a7   : > { %1365 = vmatmul.mubr.f32.vlgmr.msra.gmra.mrb[0].mxu1 %v673_v2 }
 0x1a8   : > { %1568 = vmatpush3.bf16.msra.mxu1 %v1565_v55  ;;  %v677_v12 = vsel %vm367_vm0, %v675_v4, %v674_v7  ;;  %v676_v13 = vsel %vm367_vm0, %v674_v7, %v675_v4  ;;  %v682_v14 = vsel %vm374_vm2, %v680_v11, %v681_v6  ;;  %v2171_v15 = vsel %vm374_vm2, %v681_v6, %v680_v11  ;;  %v884_v55 = vld [vmem:[#allocation7 + $0x170] sm:$0xff] }
 0x1a9   : > { %1399 = vmatprep.mubr.msk.f32.mxu1 %vm2124_vm1, %v677_v12  ;;  %1570 = vmatprep.subr.bf16.mxu1 %v1569_v5  ;;  %v1625_v57 = vpack.c.bf16 %v885_v56, %v884_v55 }
 0x1ac   : > { %1572 = vmatpush3.bf16.msra.mxu1 %v1569_v5 }
 0x1ad   : > { %1574 = vmatprep.subr.bf16.mxu1 %v1573_v16 }
 0x1b0   : > { %1576 = vmatpush3.bf16.msra.mxu1 %v1573_v16 }
 0x1b1   : > { %1578 = vmatprep.subr.bf16.mxu1 %v1577_v19 }
 0x1b4   : > { %1580 = vmatpush3.bf16.msra.mxu1 %v1577_v19 }
 0x1b5   : > { %1582 = vmatprep.subr.bf16.mxu1 %v1581_v22 }
 0x1b8   : > { %1584 = vmatpush3.bf16.msra.mxu1 %v1581_v22 }
 0x1b9   : > { %1586 = vmatprep.subr.bf16.mxu1 %v1585_v37 }
 0x1bc   : > { %1588 = vmatpush3.bf16.msra.mxu1 %v1585_v37 }
 0x1bd   : > { %1590 = vmatprep.subr.bf16.mxu1 %v1589_v26 }
 0x1c0   : > { %1592 = vmatpush3.bf16.msra.mxu1 %v1589_v26 }
 0x1c1   : > { %1594 = vmatprep.subr.bf16.mxu1 %v1593_v29 }
 0x1c4   : > { %1596 = vmatpush3.bf16.msra.mxu1 %v1593_v29 }
 0x1c5   : > { %1598 = vmatprep.subr.bf16.mxu1 %v1597_v32 }
 0x1c7   : > { %1400 = vmatmul.mubr.f32.vlgmr.msra.gmra.mrb[0].mxu1 %v676_v13 }
 0x1c8   : > { %1600 = vmatpush3.bf16.msra.mxu1 %v1597_v32  ;;  %1434 = vmatprep.mubr.f32.mxu1 %v682_v14 }
 0x1c9   : > { %1602 = vmatprep.subr.bf16.mxu1 %v1601_v35 }
 0x1cc   : > { %1604 = vmatpush3.bf16.msra.mxu1 %v1601_v35 }
 0x1cd   : > { %1606 = vmatprep.subr.bf16.mxu1 %v1605_v39 }
 0x1d0   : > { %1608 = vmatpush3.bf16.msra.mxu1 %v1605_v39 }
 0x1d1   : > { %1610 = vmatprep.subr.bf16.mxu1 %v1609_v42 }
 0x1d4   : > { %1612 = vmatpush3.bf16.msra.mxu1 %v1609_v42 }
 0x1d5   : > { %1614 = vmatprep.subr.bf16.mxu1 %v1613_v47 }
 0x1d8   : > { %1616 = vmatpush3.bf16.msra.mxu1 %v1613_v47 }
 0x1d9   : > { %1618 = vmatprep.subr.bf16.mxu1 %v1617_v50 }
 0x1dc   : > { %1620 = vmatpush3.bf16.msra.mxu1 %v1617_v50 }
 0x1dd   : > { %1622 = vmatprep.subr.bf16.mxu1 %v1621_v53 }
 0x1e0   : > { %1624 = vmatpush3.bf16.msra.mxu1 %v1621_v53 }
 0x1e1   : > { %1626 = vmatprep.subr.bf16.mxu1 %v1625_v57 }
 0x1e4   : > { %1628 = vmatpush3.bf16.msra.mxu1 %v1625_v57 }
 0x1e7   : > { %1435 = vmatmul.mubr.msk.f32.vlgmr.msra.gmra.mrb[0].mxu1 %vm2149_vm3, %v2171_v15 }
 0x2ba   : > { %v1436_v60 = vpop.f32.mrb[0].mxu1 }
 0x2bb   : > { %v970_v61 = vmul.f32 %v1436_v60, %v1110_v58  ;;  %v952_v62 = vpop.f32.mrb[1].mxu1 }
 0x2bc   : > { %v969_v63 = vmul.f32 %v1110_v58, %v952_v62 }
 0x2bd   : > { %v978_v0 = vadd.f32 %v1111_v59, %v970_v61 }
 0x2be   : > { %v977_v44 = vadd.f32 %v1111_v59, %v969_v63 }
 0x2bf   : > { %v980_v1 = vadd.f32 %v978_v0, %v2118_v43 }
 0x2c0   : > { %v979_v2 = vadd.f32 %v977_v44, %v2112_v9 }
 0x2c1   : > { %v982_v3 = vmax.f32 %v980_v1, 0.0 }
 0x2c2   : > { %v981_v4 = vmax.f32 %v979_v2, 0.0 }
 0x2c3   : > { %984 = vst [vmem:[%s325_s21 + $0x8] sm:$0xff] %v982_v3 }
 0x2c4   : > { %983 = vst [vmem:[%s325_s21] sm:$0xff] %v981_v4 }
 0x2c5   : > { %1807 = shalt.err (!%p1804_p1)
}
 0x2c6   : > { %s1808_s15 = scalar_lea.hbm %s2194_s9, 256  ;;  %s1812_s21 = scalar_lea.hbm %s2245_s7, 512 }
 0x2c7   : > { %p1809_p13 = scmp.ne.s32.totalorder %s2194_s9, %s1808_s15  ;;  %p1813_p4 = scmp.lt.u32.totalorder %s2194_s9, %s2245_s7 }
 0x2c8   : > { %p1814_p5 = scmp.lt.u32.totalorder %s1812_s21, %s1808_s15  ;;  %p1816_p11 = scmp.lt.u32.totalorder %s1808_s15, %s2194_s9 }
 0x2c9   : > { %p1810_p6 = pnand %p1809_p13, %p2265_p0 }
 0x2ca   : > { %p1815_p8 = por %p1814_p5, %p1813_p4 }
 0x2cb   : > { %p1811_p10 = pneg %p1810_p6 }
 0x2cc   : > { %p1817_p2 = por %p1816_p11, %p1815_p8 }
 0x2ce   : > { %p1818_p3 = pnand %p1817_p2, %p1811_p10 }
 0x2d0   : > { %1821 = shalt.err (!%p1818_p3)
}
 0x2d1   : > { %s1872_s30 = smov 128   ;;  %s1873_s28 = smov 8  }
 0x2d2   : > { %1647 = dma.vmem_to_hbm [thread:$0]  (%p2265_p0), %s2188_s23, 256, %s2194_s9, %s986_s22, %s1872_s30, %s1872_s30, %s1873_s28  }
 0x2d3 PF: > { %s1014_s29 = sand.u32 1, %s1852_s24   ;;  %p2266_p7 = scmp.ne.s32.totalorder %s2251_s8, 0 }
 0x2d4   : > { %p2267_p9 = scmp.ge.s32.totalorder %s1864_s27, 2  ;;  %s1015_s11 = scalar_lea.sflag [#allocation4], %s1014_s29 }
 0x2d6   : > { %p1661_p12 = pnand %p2267_p9, %p2266_p7 }
 0x2d8   : > { %1847 = dma.done.wait (!%p1661_p12), %s1015_s11, 256  }
 0x2d9   : > { %1849 = vsyncadd (!%p1661_p12), %s1015_s11, 4294967040  ;;  %p21_p1 = scmp.ge.s32.totalorder %s2030_s12, 4   ;;  %s2268_s24 = smov %s1856_s25 }
 0x2da   : > { %s2269_s25 = smov %s1860_s26  ;;  %s2270_s26 = smov %s2046_s17 }
 0x2db   : > { %s2271_s27 = smov %s2030_s12  ;;  %23 = sbr.rel (!%p21_p1) target bundleno = 6 (0x6), region = 105 }
 0x2e2   :  { %1020 = vsyncpa [#allocation3], 1 }
 0x2e3   :  { %1022 = vsyncpa [#allocation3 + $0x1], 1 }
 0x2e4   :  { %1023 = vsyncpa [#allocation6], 1 }
 0x2e5   :  { %1024 = vsyncpa [#allocation4], 1 }
 0x2e6   :  { %1026 = vsyncpa [#allocation4 + $0x1], 1 }

</bundles_post_ra>
